<compile_context>
chip_gen: v6e
topology: v6e:2x2x1
jax: 0.10.0
libtpu: 0.0.40
codegen_flags: <defaults>
</compile_context>

<pallas_src>
import jax
import jax.numpy as jnp
from jax.experimental import pallas as pl
from jax.experimental.pallas import tpu as pltpu


def _round_up(x, m):
    return ((x + m - 1) // m) * m


def _linear_t_kernel(xt_ref, w_ref, b_ref, o_ref):
    # xt_ref: (IN, tb)  x tile with batch on the lane axis
    # w_ref:  (C, IN)   full weight, PyTorch (out_features, in_features) layout
    # b_ref:  (C, 1)    bias column (broadcast along the batch/lane axis)
    # o_ref:  (C, tb)   y.T tile -> lane-dense stores
    acc = jnp.dot(w_ref[...], xt_ref[...], preferred_element_type=jnp.float32)
    o_ref[...] = (acc + b_ref[...]).astype(o_ref.dtype)


def binary_nn_forward(x, w, b, *, block_b=16384):
    """Forward pass of BinaryNN: x @ w.T + b.

    x: (B, 10) float32
    w: (c, 10) float32 (PyTorch Linear weight layout, consumed untransposed)
    b: (c,)    float32
    returns: (B, c) float32
    """
    B, in_f = x.shape
    c = w.shape[0]

    x_t = x.T                  # (in_f, B): batch becomes the MXU N/lane axis
    b_col = b.reshape(c, 1)    # broadcast along the batch (lane) axis

    # Tile choice: multiple of 128 whenever tiled, and >= 2 grid steps for
    # B >= 256 so both v7x TensorCores get work (no effect on v5e/v6e).
    block_b = max(128, (int(block_b) // 128) * 128)
    if B < 256:
        tb = B                 # single full-extent block (always legal)
    else:
        tb = min(block_b, _round_up(pl.cdiv(B, 2), 128))
    grid = (pl.cdiv(B, tb),)

    cost = pl.CostEstimate(
        flops=2 * B * in_f * c,
        transcendentals=0,
        bytes_accessed=4 * (B * in_f + c * in_f + c + B * c),
    )

    out_t = pl.pallas_call(
        _linear_t_kernel,
        out_shape=jax.ShapeDtypeStruct((c, B), x.dtype),
        grid_spec=pltpu.PrefetchScalarGridSpec(
            num_scalar_prefetch=0,
            grid=grid,
            in_specs=[
                pl.BlockSpec((in_f, tb), lambda i: (0, i)),   # x.T: tiled over batch
                pl.BlockSpec((c, in_f), lambda i: (0, 0)),    # w: resident
                pl.BlockSpec((c, 1), lambda i: (0, 0)),       # b: resident
            ],
            out_specs=pl.BlockSpec((c, tb), lambda i: (0, i)),
        ),
        compiler_params=pltpu.CompilerParams(
            dimension_semantics=("parallel",),   # megacore-shard batch on v7x
            vmem_limit_bytes=32 * 1024 * 1024,   # safe on v5e/v6e/v7x
        ),
        cost_estimate=cost,
    )(x_t, w, b_col)

    return out_t.T             # back to PyTorch (B, c) layout


if __name__ == "__main__":
    key = jax.random.PRNGKey(0)
    k_x, k_w, k_b = jax.random.split(key, 3)

    IN = 10      # fixed by the module: nn.Linear(10, c)
    C = 16       # number of classes c

    # Deterministic init mimicking nn.Linear's uniform(-1/sqrt(in), 1/sqrt(in))
    bound = 1.0 / jnp.sqrt(jnp.float32(IN))
    w = jax.random.uniform(k_w, (C, IN), minval=-bound, maxval=bound, dtype=jnp.float32)
    b = jax.random.uniform(k_b, (C,), minval=-bound, maxval=bound, dtype=jnp.float32)

    # Exercise three paths: even 2-step grid, ragged last block, single block.
    ok = True
    for B in (512, 384, 96):
        x = jax.random.normal(jax.random.fold_in(k_x, B), (B, IN), dtype=jnp.float32)
        y = binary_nn_forward(x, w, b)
        jax.block_until_ready(y)
        y_ref = x @ w.T + b
        ok = ok and (y.shape == (B, C))
        ok = ok and bool(jnp.allclose(y, y_ref, atol=1e-5, rtol=1e-5))

    assert ok
    print("KERNEL_OK")
</pallas_src>

<mosaic_0001>
module attributes {stable_mosaic.version = 11 : i64} {
  func.func @_linear_t_kernel(%arg0: i32, %arg1: memref<10x256xf32, #tpu.memory_space<vmem>>, %arg2: memref<16x10xf32, #tpu.memory_space<vmem>>, %arg3: memref<16x1xf32, #tpu.memory_space<vmem>>, %arg4: memref<16x256xf32, #tpu.memory_space<vmem>>) attributes {dimension_semantics = [#tpu.dimension_semantics<parallel>], iteration_bounds = array<i64: 2>, scalar_prefetch = 0 : i64, scratch_operands = 0 : i64, tpu.core_type = #tpu.core_type<tc>, window_params = [{transform_indices = @transform_0, window_bounds = array<i64: 10, 256>}, {pipeline_mode = #tpu.pipeline_mode<synchronous>, transform_indices = @transform_1, window_bounds = array<i64: 16, 10>}, {pipeline_mode = #tpu.pipeline_mode<synchronous>, transform_indices = @transform_2, window_bounds = array<i64: 16, 1>}, {transform_indices = @transform_3, window_bounds = array<i64: 16, 256>}]} {
    %c0 = arith.constant 0 : index
    %c0_0 = arith.constant 0 : index
    %0 = vector.load %arg2[%c0, %c0_0] : memref<16x10xf32, #tpu.memory_space<vmem>>, vector<16x10xf32>
    %c0_1 = arith.constant 0 : index
    %c0_2 = arith.constant 0 : index
    %1 = vector.load %arg1[%c0_1, %c0_2] : memref<10x256xf32, #tpu.memory_space<vmem>>, vector<10x256xf32>
    %cst = arith.constant dense<0.000000e+00> : vector<16x256xf32>
    %2 = tpu.matmul %0, %1, %cst {dimension_numbers = #tpu.dot_dimension_numbers<[1], [0], [0], [1], [0, 0, 1, 1], [], []>} : vector<16x10xf32>, vector<10x256xf32>, vector<16x256xf32> -> vector<16x256xf32>
    %c0_3 = arith.constant 0 : index
    %c0_4 = arith.constant 0 : index
    %3 = vector.load %arg3[%c0_3, %c0_4] : memref<16x1xf32, #tpu.memory_space<vmem>>, vector<16x1xf32>
    %4 = vector.broadcast %3 : vector<16x1xf32> to vector<16x256xf32>
    %5 = arith.addf %2, %4 : vector<16x256xf32>
    %c0_5 = arith.constant 0 : index
    %c0_6 = arith.constant 0 : index
    %6 = vector.load %arg4[%c0_5, %c0_6] : memref<16x256xf32, #tpu.memory_space<vmem>>, vector<16x256xf32>
    tpu.vector_store %arg4[%c0_5, %c0_6], %5 {strides = array<i32>} : memref<16x256xf32, #tpu.memory_space<vmem>>, vector<16x256xf32>,
    return
  }
  func.func @transform_0(%arg0: i32) -> (i32, i32) {
    %c0_i32 = arith.constant 0 : i32
    %c0_i32_0 = arith.constant 0 : i32
    return %c0_i32, %arg0 : i32, i32
  }
  func.func @transform_1(%arg0: i32) -> (i32, i32) {
    %c0_i32 = arith.constant 0 : i32
    %c0_i32_0 = arith.constant 0 : i32
    %c0_i32_1 = arith.constant 0 : i32
    return %c0_i32, %c0_i32_0 : i32, i32
  }
  func.func @transform_2(%arg0: i32) -> (i32, i32) {
    %c0_i32 = arith.constant 0 : i32
    %c0_i32_0 = arith.constant 0 : i32
    %c0_i32_1 = arith.constant 0 : i32
    return %c0_i32, %c0_i32_0 : i32, i32
  }
  func.func @transform_3(%arg0: i32) -> (i32, i32) {
    %c0_i32 = arith.constant 0 : i32
    %c0_i32_0 = arith.constant 0 : i32
    return %c0_i32, %arg0 : i32, i32
  }
}

</mosaic_0001>

<bundles_post_ra>
// kernel: tpu_custom_call.1
= control target key start
LH: loop header
LB: loop body
LE: loop exit
PB: predicated region body
PF: predicated region fallthrough
CT: control target
= control target key end

     0   :  { %8 = vsyncpa [#allocation3], 0  ;;  %s766_s0 = inlined_call_operand.hbm [shape: f32[10,512], index: 0, kind: input, shape index: {}]   ;;  %s767_s1 = inlined_call_operand.vmem [shape: f32[16,10], index: 1, kind: input, shape index: {}]   ;;  %s768_s2 = inlined_call_operand.vmem [shape: f32[16,1], index: 2, kind: input, shape index: {}]   ;;  %s769_s3 = inlined_call_operand.hbm [shape: f32[16,512], index: 3, kind: output, shape index: {}]  }
   0x1   :  { %10 = vsyncpa [#allocation3 + $0x1], 0 }
   0x2   :  { %11 = vsyncpa [#allocation4], 0 }
   0x3   :  { %13 = vsyncpa [#allocation4 + $0x1], 0  ;;  %s594_s12 = smov 0   ;;  %s596_s13 = smov 0  }
   0x4   :  { %s598_s14 = smov 0   ;;  %s600_s15 = smov 0  }
   0x5 LB: > { %s615_s16 = sadd.s32 4294967295, %s562_s15   ;;  %s391_s17 = sadd.s32 4294967294, %s562_s15   ;;  %s562_s15 = sphi %s600_s15, %s785_s15   ;;  %s558_s14 = sphi %s598_s14, %s784_s14   ;;  %s554_s13 = sphi %s596_s13, %s783_s13   ;;  %s550_s12 = sphi %s594_s12, %s782_s12  }
   0x6   : > { %s619_s18 = sadd.s32 1, %s562_s15   ;;  %s26_s19 = sadd.s32 1, %s558_s14 }
   0x7   : > { %s23_s20 = ssub.s32 %s562_s15, %s619_s18  ;;  %p33_p0 = scmp.ne.s32.totalorder %s558_s14, %s554_s13 }
   0x8   : > { %p24_p1 = scmp.eq.s32.totalorder %s23_s20, 0  ;;  %p34_p2 = scmp.eq.s32.totalorder %s562_s15, 0 }
   0x9   : > { %p39_p3 = scmp.ne.s32.totalorder %s554_s13, %s550_s12  ;;  %p40_p4 = scmp.eq.s32.totalorder %s615_s16, 0 }
   0xa   : > { %s631_s21 = scalar_select %p24_p1, %s558_s14, %s26_s19  }
   0xb   : > { %p633_p5 = por %p34_p2, %p33_p0  ;;  %p637_p6 = por %p40_p4, %p39_p3 }
   0xc   : > { %p105_p7 = scmp.eq.s32.totalorder %s615_s16, 1  ;;  %p111_p8 = scmp.eq.s32.totalorder %s391_s17, 1 }
   0xd   : > { %s773_s23 = scalar_select %p637_p6, 1, 0 }
   0xe   : > { %p427_p10 = scmp.lt.s32.totalorder %s562_s15, 2  ;;  %p644_p11 = por %p105_p7, %p33_p0 }
   0xf   : > { %p648_p12 = por %p111_p8, %p39_p3  ;;  %s137_s26 = sand.u32 1, %s558_s14  }
  0x10   : > { %s774_s24 = scalar_select %p644_p11, 1, 0 }
  0x11   : > { %s775_s25 = scalar_select %p648_p12, 1, 0 }
  0x12   : > { %s409_s27 = sshll.u32 %s562_s15, 8  ;;  %s394_s28 = sshll.u32 %s137_s26, 5 }
  0x13   : > { %s657_s4 = scalar_lea.hbm %s766_s0, %s409_s27  ;;  %s141_s5 = scalar_lea.vmem [#allocation2], %s394_s28 }
  0x14   : > { %s148_s6 = sshll.u32 %s141_s5, 4  ;;  %p661_p13 = pnand %p427_p10, %p633_p5  ;;  %s665_s6 = int_to_ptr.vmem [resolvable:$true] %s148_s6 }
  0x15   : > { %s668_s8 = scalar_lea.sflag [#allocation3], %s137_s26  ;;  %s470_s9 = scalar_lea.hbm %s657_s4, 512 }
  0x16   : > { %p471_p1 = scmp.ne.s32.totalorder %s657_s4, %s470_s9  ;;  %p472_p2 = pneg %p661_p13 }
  0x17   : > { %s475_s17 = scalar_lea.hbm %s766_s0, 1024  ;;  %p476_p5 = scmp.lt.s32.totalorder %s657_s4, %s766_s0 }
  0x18   : > { %p473_p3 = pnand %p472_p2, %p471_p1  ;;  %p477_p7 = scmp.lt.s32.totalorder %s475_s17, %s470_s9 }
  0x1a   : > { %p474_p4 = pneg %p473_p3  ;;  %p478_p8 = por %p477_p7, %p476_p5 }
  0x1c   : > { %p479_p10 = pnand %p478_p8, %p474_p4 }
  0x1e   : > { %482 = shalt.err (!%p479_p10)
}
  0x1f   : > { %s483_s22 = scalar_lea.vmem %s665_s6, 512  ;;  %s564_s26 = smov [#allocation2]  }
  0x20   : > { %p484_p9 = scmp.ne.s32.totalorder %s665_s6, %s483_s22  ;;  %s488_s27 = sshll.u32 %s564_s26, 4  ;;  %s489_s27 = int_to_ptr.vmem [resolvable:$false] %s488_s27 }
  0x21   : > { %s490_s28 = scalar_lea.vmem %s489_s27, 1024  ;;  %p491_p3 = scmp.lt.s32.totalorder %s665_s6, %s489_s27 }
  0x22   : > { %p486_p0 = pnand %p484_p9, %p472_p2  ;;  %p492_p12 = scmp.lt.s32.totalorder %s490_s28, %s483_s22 }
  0x24   : > { %p487_p1 = pneg %p486_p0  ;;  %p493_p11 = por %p492_p12, %p491_p3 }
  0x26   : > { %p494_p6 = pnand %p493_p11, %p487_p1 }
  0x28   : > { %497 = shalt.err (!%p494_p6)
}
  0x29   : > { %s565_s29 = smov 512   ;;  %s566_s30 = smov 256  }
  0x2a   : > { %s567_s5 = smov 16   ;;  %p156_p9 = scmp.lt.s32.totalorder %s562_s15, 3 }
  0x2b   : > { %422 = dma.hbm_to_vmem [thread:$0]  (!%p661_p13), %s657_s4, 512, %s665_s6, %s668_s8, %s565_s29, %s566_s30, %s567_s5  }
  0x2c   : > { %p777_p0 = scmp.ge.s32.totalorder %s562_s15, 1 }
  0x2e   : > { %p157_p2 = pnand %p777_p0, %p156_p9 }
  0x2f   : > { %s693_s9 = sand.u32 (!%p157_p2), 1, %s554_s13   ;;  %p778_p6 = scmp.ne.s32.totalorder (!%p157_p2), %s773_s23, 0 }
  0x30   : > { %160 = sbr.rel (%p157_p2) target bundleno = 273 (0x111), region = 32  ;;  %s398_s10 = sshll.u32 (!%p157_p2), %s693_s9, 5 }
  0x31   : > { %s163_s11 = scalar_lea.sflag (!%p157_p2), [#allocation3], %s693_s9  ;;  %s166_s17 = scalar_lea.vmem (!%p157_p2), [#allocation2], %s398_s10 }
  0x35   : > { %541 = dma.done.wait (%p778_p6), %s163_s11, 512  }
  0x36   : > { %543 = vsyncadd (%p778_p6), %s163_s11, 4294966784  ;;  %v568_v0 = vmov 0.0   ;;  %v569_v1 = vmov 0   ;;  %vm216_vm0 = vcmask 1041408   ;;  %v196_v2 = vld [vmem:[%s166_s17 + $0x18] sm:$0x3] }
  0x37   : > { %287 = vmatprep.mubr.f32.mxu0 %v568_v0  ;;  %293 = vmatprep.mubr.f32.mxu1 %v568_v0  ;;  %v195_v3 = vld [vmem:[%s166_s17 + $0x10] sm:$0x3]  ;;  %v194_v4 = vld [vmem:[%s166_s17 + $0x8] sm:$0xff]  ;;  %v193_v5 = vld [vmem:[%s166_s17] sm:$0xff]  ;;  %vm209_vm1 = vcmask 80896   ;;  %s188_s26 = scalar_lea.vmem [#allocation5], %s398_s10 }
  0x38   : > { %469 = vset.pattern.permute.xlu0 %v569_v1  ;;  %400 = vmatprep.subr.msk.mxu0 %vm216_vm0, %v196_v2  ;;  %v191_v6 = vld [vmem:[%s767_s1] sm:$0xff]  ;;  %v192_v7 = vld [vmem:[%s767_s1 + $0x8] sm:$0xff]  ;;  %s318_s27 = sshll.u32 %s188_s26, 4  ;;  %s410_s28 = sshll.u32 %s615_s16, 8  ;;  %s718_s27 = int_to_ptr.vmem [resolvable:$true] %s318_s27 }
  0x39   : > { %411 = vmatprep.subr.msk.mxu1 %vm216_vm0, %v196_v2  ;;  %401 = vmatpush1.msk.msra.mxu0 %vm216_vm0, %v195_v3  ;;  %v197_v8 = vld [vmem:[%s768_s2] sm:$0xff]  ;;  %v198_v9 = vld [vmem:[%s768_s2 + $0x8] sm:$0xff]  ;;  %s723_s5 = scalar_lea.hbm %s769_s3, %s410_s28  ;;  %s305_s16 = scalar_lea.sflag [#allocation4], %s693_s9 }
  0x3a   : > { %413 = vmatpush1.msk.msra.mxu1 %vm216_vm0, %v195_v3  ;;  %253 = vmatprep.subr.mxu0 %v194_v4  ;;  %s498_s10 = scalar_lea.vmem %s718_s27, 512  ;;  %p779_p12 = scmp.ne.s32.totalorder %s774_s24, 0 }
  0x3b   : > { %412 = vmatprep.subr.mxu1 %v194_v4  ;;  %254 = vmatpush1.msra.mxu0 %v193_v5  ;;  %p499_p11 = scmp.ne.s32.totalorder %s718_s27, %s498_s10  ;;  %s570_s11 = smov [#allocation5]  }
  0x3c   : > { %414 = vmatpush1.msra.mxu1 %v193_v5  ;;  %402 = vmatmul.mubr.msk.f32.vlgmr.msra.gmra.mxu0 %vm209_vm1, %v191_v6  ;;  %s502_s17 = sshll.u32 %s570_s11, 4  ;;  %s503_s17 = int_to_ptr.vmem [resolvable:$false] %s502_s17 }
  0x3d   : > { %403 = vmatmul.mubr.msk.f32.vlgmr.msra.gmra.mxu1 %vm209_vm1, %v192_v7  ;;  %201 = vperm.xlu0 %469, %v197_v8   ;;  %p500_p13 = pnand %p499_p11, %p779_p12  ;;  %s504_s4 = scalar_lea.vmem %s503_s17, 1024 }
  0x3e   : > { %p505_p5 = scmp.lt.s32.totalorder %s718_s27, %s503_s17  ;;  %p506_p7 = scmp.lt.s32.totalorder %s504_s4, %s498_s10 }
  0x3f   : > { %p501_p4 = pneg %p500_p13 }
  0x40   : > { %p507_p8 = por %p506_p7, %p505_p5 }
  0x41   : > { %206 = vperm.xlu0 %469, %v198_v9  }
  0x42   : > { %p508_p10 = pnand %p507_p8, %p501_p4 }
  0xb8   : > { %v202_v10 = vpop.permute.xlu0 %201 }
  0xbc   : > { %v207_v11 = vpop.permute.xlu0 %206 }
  0xfc   : > { %v289_v12 = vpop.f32.mrf.mxu0 }
  0xfd   : > { %v295_v13 = vpop.f32.mrf.mxu1  ;;  %v290_v14 = vadd.f32 %v289_v12, %v202_v10 }
  0xfe   : > { %v296_v15 = vadd.f32 %v295_v13, %v207_v11  ;;  %v291_v16 = vpop.f32.mrf.mxu0 }
  0xff   : > { %v297_v17 = vpop.f32.mrf.mxu1  ;;  %300 = vst [vmem:[%s188_s26] sm:$0xff] %v290_v14  ;;  %v292_v18 = vadd.f32 %v291_v16, %v202_v10 }
 0x100   : > { %302 = vst [vmem:[%s188_s26 + $0x10] sm:$0xff] %v296_v15  ;;  %v298_v19 = vadd.f32 %v297_v17, %v207_v11 }
 0x101   : > { %301 = vst [vmem:[%s188_s26 + $0x8] sm:$0xff] %v292_v18 }
 0x102   : > { %303 = vst [vmem:[%s188_s26 + $0x18] sm:$0xff] %v298_v19 }
 0x103   : > { %511 = shalt.err (!%p508_p10)
}
 0x104   : > { %s512_s6 = scalar_lea.hbm %s723_s5, 512  ;;  %s516_s8 = scalar_lea.hbm %s769_s3, 1024 }
 0x105   : > { %p513_p1 = scmp.ne.s32.totalorder %s723_s5, %s512_s6  ;;  %p517_p0 = scmp.lt.s32.totalorder %s723_s5, %s769_s3 }
 0x106   : > { %p518_p2 = scmp.lt.s32.totalorder %s516_s8, %s512_s6 }
 0x107   : > { %p514_p3 = pnand %p513_p1, %p779_p12 }
 0x108   : > { %p519_p6 = por %p518_p2, %p517_p0 }
 0x109   : > { %p515_p9 = pneg %p514_p3 }
 0x10b   : > { %p520_p11 = pnand %p519_p6, %p515_p9 }
 0x10d   : > { %523 = shalt.err (!%p520_p11)
}
 0x10e   : > { %s571_s22 = smov 256   ;;  %s572_s26 = smov 512  }
 0x10f   : > { %s573_s28 = smov 16  }
 0x110   : > { %417 = dma.vmem_to_hbm [thread:$0]  (%p779_p12), %s718_s27, 512, %s723_s5, %s305_s16, %s571_s22, %s572_s26, %s573_s28  }
 0x111 PF: > { %s333_s29 = sand.u32 1, %s550_s12   ;;  %p780_p13 = scmp.ne.s32.totalorder %s775_s25, 0 }
 0x112   : > { %p781_p4 = scmp.ge.s32.totalorder %s562_s15, 2  ;;  %s334_s30 = scalar_lea.sflag [#allocation4], %s333_s29 }
 0x114   : > { %p424_p5 = pnand %p781_p4, %p780_p13 }
 0x116   : > { %p425_p7 = pneg %p424_p5 }
 0x118   : > { %545 = dma.done.wait (%p425_p7), %s334_s30, 512  }
 0x119   : > { %547 = vsyncadd (%p425_p7), %s334_s30, 4294966784  ;;  %p16_p8 = scmp.ge.s32.totalorder %s619_s18, 4   ;;  %s782_s12 = smov %s554_s13 }
 0x11a   : > { %s783_s13 = smov %s558_s14  ;;  %s784_s14 = smov %s631_s21 }
 0x11b   : > { %s785_s15 = smov %s619_s18  ;;  %18 = sbr.rel (!%p16_p8) target bundleno = 5 (0x5), region = 77 }
 0x120   :  { %339 = vsyncpa [#allocation3], 1 }
 0x121   :  { %341 = vsyncpa [#allocation3 + $0x1], 1 }
 0x122   :  { %342 = vsyncpa [#allocation4], 1 }
 0x123   :  { %344 = vsyncpa [#allocation4 + $0x1], 1 }

</bundles_post_ra>
